<compile_context>
chip_gen: v6e
topology: v6e:2x2x1
jax: 0.10.0
libtpu: 0.0.40
codegen_flags: <defaults>
</compile_context>

<pallas_src>
import jax
import jax.numpy as jnp
from jax.experimental import pallas as pl
from jax.experimental.pallas import tpu as pltpu


def _mtl_kernel(x_ref, we_ref, be_ref, wd_ref, bd_ref, out_ref):
    # Shared encoder: bf16 MXU inputs, f32 accumulation, f32 elementwise epilogue.
    rep = jnp.dot(x_ref[...], we_ref[...], preferred_element_type=jnp.float32)
    rep = jnp.maximum(rep + be_ref[...], 0.0)
    # All T decoder heads fused into one MXU matmul: (TB, H) @ (H, N_pad).
    out = jnp.dot(rep.astype(wd_ref.dtype), wd_ref[...],
                  preferred_element_type=jnp.float32)
    out_ref[...] = (out + bd_ref[...]).astype(out_ref.dtype)


def fuse_mtl_params(enc_w, enc_b, dec_w, dec_b):
    """One-time (model-init) parameter fusion — hoisted out of the forward path.

    Fuses all task decoder heads (T, H, D_out) -> (H, T*D_out), zero-pads to a
    128-lane-dense slab, and pre-casts the MXU-facing weights to bf16.
    Biases stay f32 for the f32 epilogue.
    """
    D_in, H = enc_w.shape
    T, _, D_out = dec_w.shape
    N = T * D_out
    N_pad = ((N + 127) // 128) * 128
    wd_flat = jnp.transpose(dec_w, (1, 0, 2)).reshape(H, N)
    bd_flat = dec_b.reshape(1, N)
    if N_pad != N:
        wd_flat = jnp.pad(wd_flat, ((0, 0), (0, N_pad - N)))
        bd_flat = jnp.pad(bd_flat, ((0, 0), (0, N_pad - N)))
    return {
        "enc_w": enc_w.astype(jnp.bfloat16),
        "enc_b": enc_b.reshape(1, H).astype(jnp.float32),
        "dec_w": wd_flat.astype(jnp.bfloat16),
        "dec_b": bd_flat.astype(jnp.float32),
        "meta": (D_in, H, T, D_out, N, N_pad),
    }


def abs_architecture_forward(x, fused, task_names, task_name=None, block_b=512):
    """MTL forward (multi_input=False, rep_grad=False). Returns {task: (B, D_out)}."""
    D_in, H, T, D_out, N, N_pad = fused["meta"]
    B = x.shape[0]
    assert x.shape[1] == D_in and T == len(task_names)

    # Batch tile: 512 rows for large B (near HBM-roofline tile), else B rounded to 8.
    TB = block_b if B >= block_b else max(8, ((B + 7) // 8) * 8)
    B_pad = ((B + TB - 1) // TB) * TB
    x_bf = x.astype(jnp.bfloat16)
    if B_pad != B:
        x_bf = jnp.pad(x_bf, ((0, B_pad - B), (0, 0)))

    cost = pl.CostEstimate(
        flops=2 * B_pad * (D_in * H + H * N_pad),
        transcendentals=0,
        bytes_accessed=(B_pad * D_in * 2          # x (bf16)
                        + D_in * H * 2            # encoder W (bf16)
                        + H * N_pad * 2           # fused decoder W (bf16)
                        + H * 4 + N_pad * 4       # biases (f32)
                        + B_pad * N_pad * 4),     # output (f32)
    )

    out_flat = pl.pallas_call(
        _mtl_kernel,
        out_shape=jax.ShapeDtypeStruct((B_pad, N_pad), jnp.float32),
        grid=(B_pad // TB,),
        in_specs=[
            pl.BlockSpec((TB, D_in), lambda i: (i, 0)),    # x tile (pipelined)
            pl.BlockSpec((D_in, H), lambda i: (0, 0)),     # encoder W (VMEM-resident)
            pl.BlockSpec((1, H), lambda i: (0, 0)),        # encoder bias
            pl.BlockSpec((H, N_pad), lambda i: (0, 0)),    # fused decoder W (resident)
            pl.BlockSpec((1, N_pad), lambda i: (0, 0)),    # fused decoder bias
        ],
        out_specs=pl.BlockSpec((TB, N_pad), lambda i: (i, 0)),
        compiler_params=pltpu.CompilerParams(
            dimension_semantics=("parallel",)),            # v7x: both TensorCores
        cost_estimate=cost,
    )(x_bf, fused["enc_w"], fused["enc_b"], fused["dec_w"], fused["dec_b"])

    # rep_grad=False -> _prepare_rep is identity; unpad batch/lanes and split heads.
    # TODO(synk): at very large B, benchmark an unpadded (B, N) output (masked stores)
    # against this lane-dense padded slab if HBM-writeback-bound.
    out_t = out_flat[:B, :N].reshape(B, T, D_out)
    return {task: out_t[:, t, :]
            for t, task in enumerate(task_names)
            if task_name is None or task == task_name}


if __name__ == "__main__":
    # Small, TPU-friendly shapes.
    B, D_in, H, D_out = 8, 32, 128, 16
    task_names = ["segmentation", "depth", "normal"]
    T = len(task_names)

    key = jax.random.PRNGKey(0)
    kx, kwe, kbe, kwd, kbd = jax.random.split(key, 5)

    x = jax.random.normal(kx, (B, D_in), dtype=jnp.float32)
    enc_w = jax.random.normal(kwe, (D_in, H), dtype=jnp.float32) * 0.1
    enc_b = jax.random.normal(kbe, (H,), dtype=jnp.float32) * 0.1
    dec_w = jax.random.normal(kwd, (T, H, D_out), dtype=jnp.float32) * 0.1
    dec_b = jax.random.normal(kbd, (T, D_out), dtype=jnp.float32) * 0.1

    # "Model init": fuse decoder heads + cast MXU weights once, outside the forward.
    fused = fuse_mtl_params(enc_w, enc_b, dec_w, dec_b)
    jax.block_until_ready(fused)

    out = abs_architecture_forward(x, fused, task_names)
    jax.block_until_ready(out)

    # Pure-JAX f32 reference of forward semantics (kernel uses bf16 MXU inputs,
    # so compare with bf16-appropriate tolerance).
    rep_ref = jnp.maximum(x @ enc_w + enc_b[None, :], 0.0)
    ok = True
    for t, task in enumerate(task_names):
        ref = rep_ref @ dec_w[t] + dec_b[t][None, :]
        ok &= bool(jnp.allclose(out[task], ref, atol=3e-2, rtol=3e-2))
        ok &= out[task].shape == (B, D_out)
    assert ok, "mismatch vs reference"

    print("KERNEL_OK")
</pallas_src>

<mosaic_0001>
module attributes {stable_mosaic.version = 11 : i64} {
  func.func @_mtl_kernel(%arg0: i32, %arg1: memref<8x32xbf16, #tpu.memory_space<vmem>>, %arg2: memref<32x128xbf16, #tpu.memory_space<vmem>>, %arg3: memref<1x128xf32, #tpu.memory_space<vmem>>, %arg4: memref<128x128xbf16, #tpu.memory_space<vmem>>, %arg5: memref<1x128xf32, #tpu.memory_space<vmem>>, %arg6: memref<8x128xf32, #tpu.memory_space<vmem>>) attributes {dimension_semantics = [#tpu.dimension_semantics<parallel>], iteration_bounds = array<i64: 1>, scalar_prefetch = 0 : i64, scratch_operands = 0 : i64, tpu.core_type = #tpu.core_type<tc>, window_params = [{transform_indices = @transform_0, window_bounds = array<i64: 8, 32>}, {pipeline_mode = #tpu.pipeline_mode<synchronous>, transform_indices = @transform_1, window_bounds = array<i64: 32, 128>}, {pipeline_mode = #tpu.pipeline_mode<synchronous>, transform_indices = @transform_2, window_bounds = array<i64: 1, 128>}, {pipeline_mode = #tpu.pipeline_mode<synchronous>, transform_indices = @transform_3, window_bounds = array<i64: 128, 128>}, {pipeline_mode = #tpu.pipeline_mode<synchronous>, transform_indices = @transform_4, window_bounds = array<i64: 1, 128>}, {transform_indices = @transform_5, window_bounds = array<i64: 8, 128>}]} {
    %c0 = arith.constant 0 : index
    %c0_0 = arith.constant 0 : index
    %0 = vector.load %arg1[%c0, %c0_0] : memref<8x32xbf16, #tpu.memory_space<vmem>>, vector<8x32xbf16>
    %c0_1 = arith.constant 0 : index
    %c0_2 = arith.constant 0 : index
    %1 = vector.load %arg2[%c0_1, %c0_2] : memref<32x128xbf16, #tpu.memory_space<vmem>>, vector<32x128xbf16>
    %cst = arith.constant dense<0.000000e+00> : vector<8x128xf32>
    %2 = tpu.matmul %0, %1, %cst {dimension_numbers = #tpu.dot_dimension_numbers<[1], [0], [0], [1], [0, 0, 1, 1], [], []>} : vector<8x32xbf16>, vector<32x128xbf16>, vector<8x128xf32> -> vector<8x128xf32>
    %c0_3 = arith.constant 0 : index
    %c0_4 = arith.constant 0 : index
    %3 = vector.load %arg3[%c0_3, %c0_4] : memref<1x128xf32, #tpu.memory_space<vmem>>, vector<1x128xf32>
    %4 = vector.broadcast %3 : vector<1x128xf32> to vector<8x128xf32>
    %5 = arith.addf %2, %4 : vector<8x128xf32>
    %cst_5 = arith.constant 0.000000e+00 : f32
    %6 = vector.broadcast %cst_5 : f32 to vector<8x128xf32>
    %7 = arith.maximumf %5, %6 : vector<8x128xf32>
    %8 = arith.truncf %7 : vector<8x128xf32> to vector<8x128xbf16>
    %c0_6 = arith.constant 0 : index
    %c0_7 = arith.constant 0 : index
    %9 = vector.load %arg4[%c0_6, %c0_7] : memref<128x128xbf16, #tpu.memory_space<vmem>>, vector<128x128xbf16>
    %cst_8 = arith.constant dense<0.000000e+00> : vector<8x128xf32>
    %10 = tpu.matmul %8, %9, %cst_8 {dimension_numbers = #tpu.dot_dimension_numbers<[1], [0], [0], [1], [0, 0, 1, 1], [], []>} : vector<8x128xbf16>, vector<128x128xbf16>, vector<8x128xf32> -> vector<8x128xf32>
    %c0_9 = arith.constant 0 : index
    %c0_10 = arith.constant 0 : index
    %11 = vector.load %arg5[%c0_9, %c0_10] : memref<1x128xf32, #tpu.memory_space<vmem>>, vector<1x128xf32>
    %12 = vector.broadcast %11 : vector<1x128xf32> to vector<8x128xf32>
    %13 = arith.addf %10, %12 : vector<8x128xf32>
    %c0_11 = arith.constant 0 : index
    %c0_12 = arith.constant 0 : index
    %14 = vector.load %arg6[%c0_11, %c0_12] : memref<8x128xf32, #tpu.memory_space<vmem>>, vector<8x128xf32>
    tpu.vector_store %arg6[%c0_11, %c0_12], %13 {strides = array<i32>} : memref<8x128xf32, #tpu.memory_space<vmem>>, vector<8x128xf32>,
    return
  }
  func.func @transform_0(%arg0: i32) -> (i32, i32) {
    %c0_i32 = arith.constant 0 : i32
    %c0_i32_0 = arith.constant 0 : i32
    return %arg0, %c0_i32 : i32, i32
  }
  func.func @transform_1(%arg0: i32) -> (i32, i32) {
    %c0_i32 = arith.constant 0 : i32
    %c0_i32_0 = arith.constant 0 : i32
    %c0_i32_1 = arith.constant 0 : i32
    return %c0_i32, %c0_i32_0 : i32, i32
  }
  func.func @transform_2(%arg0: i32) -> (i32, i32) {
    %c0_i32 = arith.constant 0 : i32
    %c0_i32_0 = arith.constant 0 : i32
    %c0_i32_1 = arith.constant 0 : i32
    return %c0_i32, %c0_i32_0 : i32, i32
  }
  func.func @transform_3(%arg0: i32) -> (i32, i32) {
    %c0_i32 = arith.constant 0 : i32
    %c0_i32_0 = arith.constant 0 : i32
    %c0_i32_1 = arith.constant 0 : i32
    return %c0_i32, %c0_i32_0 : i32, i32
  }
  func.func @transform_4(%arg0: i32) -> (i32, i32) {
    %c0_i32 = arith.constant 0 : i32
    %c0_i32_0 = arith.constant 0 : i32
    %c0_i32_1 = arith.constant 0 : i32
    return %c0_i32, %c0_i32_0 : i32, i32
  }
  func.func @transform_5(%arg0: i32) -> (i32, i32) {
    %c0_i32 = arith.constant 0 : i32
    %c0_i32_0 = arith.constant 0 : i32
    return %arg0, %c0_i32 : i32, i32
  }
}

</mosaic_0001>

<bundles_post_ra>
// kernel: tpu_custom_call.1
= control target key start
LH: loop header
LB: loop body
LE: loop exit
PB: predicated region body
PF: predicated region fallthrough
CT: control target
= control target key end

     0   :  { %10 = vsyncpa [#allocation3], 0  ;;  %s472_s0 = inlined_call_operand.hbm [shape: bf16[8,32], index: 0, kind: input, shape index: {}]   ;;  %s473_s1 = inlined_call_operand.hbm [shape: bf16[32,128], index: 1, kind: input, shape index: {}]   ;;  %s474_s2 = inlined_call_operand.vmem [shape: f32[1,128], index: 2, kind: input, shape index: {}]   ;;  %s475_s3 = inlined_call_operand.hbm [shape: bf16[128,128], index: 3, kind: input, shape index: {}]   ;;  %s476_s4 = inlined_call_operand.vmem [shape: f32[1,128], index: 4, kind: input, shape index: {}]   ;;  %s477_s5 = inlined_call_operand.hbm [shape: f32[8,128], index: 5, kind: output, shape index: {}]  }
   0x1   :  { %11 = vsyncpa [#allocation6], 0 }
   0x2   :  { %12 = vsyncpa [#allocation4], 0  ;;  %s416_s18 = smov [#allocation5]  }
   0x3   :  { %s28_s19 = sshll.u32 %s416_s18, 4  ;;  %s29_s19 = int_to_ptr.vmem [resolvable:$true] %s28_s19 }
   0x4   :  { %s338_s20 = scalar_lea.vmem %s29_s19, 256  ;;  %p343_p1 = scmp.lt.s32.totalorder %s29_s19, %s29_s19 }
   0x5   :  { %p339_p0 = scmp.ne.s32.totalorder %s29_s19, %s338_s20  ;;  %p344_p2 = scmp.lt.s32.totalorder %s338_s20, %s338_s20 }
   0x7   :  { %p345_p3 = por %p344_p2, %p343_p1 }
   0x9   :  { %p346_p4 = pnand %p345_p3, %p339_p0 }
   0xb   :  { %349 = shalt.err (!%p346_p4)
}
   0xc   :  { %s417_s21 = smov 64   ;;  %s418_s22 = smov 4  }
   0xd   :  { %34 = dma.hbm_to_vmem [thread:$0]  %s473_s1, 256, %s29_s19, [#allocation6], %s417_s21, %s417_s21, %s418_s22  }
   0xe   :  { %s419_s25 = smov [#allocation2]   ;;  %s420_s27 = smov [#allocation7]  }
   0xf   :  { %s19_s26 = sshll.u32 %s419_s25, 4  ;;  %s42_s28 = sshll.u32 %s420_s27, 4  ;;  %s20_s26 = int_to_ptr.vmem [resolvable:$true] %s19_s26  ;;  %s43_s28 = int_to_ptr.vmem [resolvable:$true] %s42_s28 }
  0x10   :  { %s358_s29 = scalar_lea.vmem %s20_s26, 64  ;;  %p363_p6 = scmp.lt.s32.totalorder %s20_s26, %s20_s26 }
  0x11   :  { %p359_p5 = scmp.ne.s32.totalorder %s20_s26, %s358_s29  ;;  %p364_p7 = scmp.lt.s32.totalorder %s358_s29, %s358_s29 }
  0x13   :  { %p365_p8 = por %p364_p7, %p363_p6 }
  0x15   :  { %p366_p9 = pnand %p365_p8, %p359_p5 }
  0x17   :  { %369 = shalt.err (!%p366_p9)
}
  0x18   :  { %22 = dma.hbm_to_vmem [thread:$0]  %s472_s0, 64, %s20_s26, [#allocation3]  }
  0x19   :  { %s378_s7 = scalar_lea.vmem %s43_s28, 1024  ;;  %p383_p11 = scmp.lt.s32.totalorder %s43_s28, %s43_s28 }
  0x1a   :  { %p379_p10 = scmp.ne.s32.totalorder %s43_s28, %s378_s7  ;;  %p384_p12 = scmp.lt.s32.totalorder %s378_s7, %s378_s7 }
  0x1c   :  { %p385_p13 = por %p384_p12, %p383_p11 }
  0x1e   :  { %p386_p0 = pnand %p385_p13, %p379_p10 }
  0x20   :  { %389 = shalt.err (!%p386_p0)
}
  0x21   :  { %48 = dma.hbm_to_vmem [thread:$0]  %s475_s3, 1024, %s43_s28, [#allocation6], %s417_s21, %s417_s21, %s418_s22  }
  0x22   :  { %410 = dma.done.wait [#allocation3], 64  }
  0x23   :  { %411 = vsyncadd [#allocation3], 4294967232 }
  0x24   :  { %412 = dma.done.wait [#allocation6], 1280  }
  0x25   :  { %413 = vsyncadd [#allocation6], 4294966016  ;;  %v421_v0 = vmov 0.0   ;;  %vm422_vm0 = vmmov 0   ;;  %v320_v1 = vld [vmem:[#allocation5 + $0x8] sm:$0xff]   ;;  %v321_v2 = vld [vmem:[#allocation5] sm:$0xff]  }
  0x26   :  { %284 = vmatprep.subr.bf16.mxu0 %v421_v0  ;;  %288 = vmatprep.mubr.msk.bf16.mxu0 %vm422_vm0, %v421_v0  ;;  %v322_v3 = vld [vmem:[#allocation7 + $0x38] sm:$0xff]   ;;  %vm85_vm1 = vcmask 261120   ;;  %v323_v4 = vld [vmem:[#allocation7 + $0x30] sm:$0xff]   ;;  %v61_v5 = vld [vmem:[#allocation2] sm:$0xf]  ;;  %s423_s11 = smov [#allocation8]  }
  0x27   :  { %292 = vmatprep.subr.bf16.mxu1 %v421_v0  ;;  %308 = vmatprep.mubr.msk.bf16.mxu1 %vm422_vm0, %v421_v0  ;;  %v324_v6 = vld [vmem:[#allocation7 + $0x28] sm:$0xff]   ;;  %v325_v7 = vld [vmem:[#allocation7 + $0x20] sm:$0xff]   ;;  %v326_v8 = vld [vmem:[#allocation7 + $0x18] sm:$0xff]   ;;  %s249_s12 = sshll.u32 %s423_s11, 4  ;;  %s250_s12 = int_to_ptr.vmem [resolvable:$true] %s249_s12 }
  0x28   :  { %285 = vmatpush3.bf16.msra.mxu0 %v320_v1  ;;  %293 = vmatpush3.bf16.msra.mxu1 %v322_v3  ;;  %v327_v9 = vld [vmem:[#allocation7 + $0x10] sm:$0xff]   ;;  %v328_v10 = vld [vmem:[#allocation7 + $0x8] sm:$0xff]   ;;  %v329_v11 = vld [vmem:[#allocation7] sm:$0xff]   ;;  %p395_p2 = scmp.lt.s32.totalorder %s250_s12, %s250_s12 }
  0x29   :  { %286 = vmatprep.subr.bf16.mxu0 %v421_v0  ;;  %294 = vmatprep.subr.bf16.mxu1 %v421_v0  ;;  %v259_v12 = vld [vmem:[%s474_s2] ss:$0 sm:$0xff]  ;;  %s390_s2 = scalar_lea.vmem %s250_s12, 128 }
  0x2a   :  { %v263_v20 = vld [vmem:[%s476_s4] ss:$0 sm:$0xff]  ;;  %p391_p1 = scmp.ne.s32.totalorder %s250_s12, %s390_s2  ;;  %p396_p3 = scmp.lt.s32.totalorder %s390_s2, %s390_s2 }
  0x2c   :  { %287 = vmatpush3.bf16.msra.mxu0 %v321_v2  ;;  %295 = vmatpush3.bf16.msra.mxu1 %v323_v4  ;;  %p397_p4 = por %p396_p3, %p395_p2 }
  0x2d   :  { %296 = vmatprep.subr.bf16.mxu1 %v421_v0 }
  0x2e   :  { %p398_p5 = pnand %p397_p4, %p391_p1 }
  0x2f   :  { %289 = vmatmul.mubr.msk.bf16.vlgmr.msra.gmra.mxu0 %vm85_vm1, %v61_v5 }
  0x30   :  { %297 = vmatpush3.bf16.msra.mxu1 %v324_v6 }
  0x31   :  { %298 = vmatprep.subr.bf16.mxu1 %v421_v0 }
  0x34   :  { %299 = vmatpush3.bf16.msra.mxu1 %v325_v7 }
  0x35   :  { %300 = vmatprep.subr.bf16.mxu1 %v421_v0 }
  0x38   :  { %301 = vmatpush3.bf16.msra.mxu1 %v326_v8 }
  0x39   :  { %302 = vmatprep.subr.bf16.mxu1 %v421_v0 }
  0x3c   :  { %303 = vmatpush3.bf16.msra.mxu1 %v327_v9 }
  0x3d   :  { %304 = vmatprep.subr.bf16.mxu1 %v421_v0 }
  0x40   :  { %305 = vmatpush3.bf16.msra.mxu1 %v328_v10 }
  0x41   :  { %306 = vmatprep.subr.bf16.mxu1 %v421_v0 }
  0x44   :  { %307 = vmatpush3.bf16.msra.mxu1 %v329_v11 }
  0xef   :  { %v123_v13 = vpop.f32.mrf.mxu0 }
  0xf0   :  { %v124_v14 = vadd.f32 %v259_v12, %v123_v13 }
  0xf1   :  { %v290_v15 = vpop.f32.mrf.mxu0 }
  0xf2   :  { %v129_v16 = vmax.f32 %v124_v14, 0.0 }
  0xf3   :  { %v126_v17 = vpop.f32.mrf.mxu0 }
  0xf4   :  { %v130_v18 = vpack.c.bf16 %v129_v16, %v129_v16 }
  0xf5   :  { %v291_v19 = vpop.f32.mrf.mxu0 }
  0xf6   :  { %309 = vmatmul.mubr.bf16.vlgmr.msra.gmra.mxu1 %v130_v18 }
 0x1b6   :  { %v236_v21 = vpop.f32.mrf.mxu1 }
 0x1b7   :  { %v237_v22 = vadd.f32 %v263_v20, %v236_v21 }
 0x1b8   :  { %v310_v23 = vpop.f32.mrf.mxu1 }
 0x1b9   :  { %242 = vst [vmem:[#allocation8] sm:$0xff] %v237_v22 }
 0x1ba   :  { %v239_v24 = vpop.f32.mrf.mxu1 }
 0x1bb   :  { %401 = shalt.err (!%p398_p5)
}
 0x1bc   :  { %252 = dma.vmem_to_hbm [thread:$0]  %s250_s12, 128, %s477_s5, [#allocation4]   ;;  %v311_v25 = vpop.f32.mrf.mxu1 }
 0x1bd   :  { %414 = dma.done.wait [#allocation4], 128  }
 0x1be   :  { %415 = vsyncadd [#allocation4], 4294967168 }
 0x1bf   :  { %256 = vsyncpa [#allocation3], 1 }
 0x1c0   :  { %257 = vsyncpa [#allocation6], 1 }
 0x1c1   :  { %258 = vsyncpa [#allocation4], 1 }

</bundles_post_ra>
